<compile_context>
chip_gen: v5e
topology: v5e:2x2
jax: 0.10.0
libtpu: 0.0.40
codegen_flags: <defaults>
</compile_context>

<pallas_src>
import functools

import jax
import jax.numpy as jnp
from jax.experimental import pallas as pl
from jax.experimental.pallas import tpu as pltpu


# --------------------------------------------------------------------------------------------
# Slab layout: every segment starts on an 8-row (sublane-tile) boundary so the in-kernel static
# slices never cross a (8,128) tile boundary.
# --------------------------------------------------------------------------------------------
def _row_offsets(obs, ehid):
    def up8(n):
        return (n + 7) // 8 * 8

    r_w1 = 0
    r_b1 = r_w1 + up8(obs)     # layer-1 bias (1 valid row in an 8-row block)
    r_w2 = r_b1 + 8
    r_b2 = r_w2 + ehid         # ehid is a multiple of 128 (hence of 8)
    r_wh = r_b2 + 8
    r_bh = r_wh + ehid
    total = r_bh + 8
    return r_w1, r_b1, r_w2, r_b2, r_wh, r_bh, total


# --------------------------------------------------------------------------------------------
# Kernel: three lane-dense matmuls, all operands read from one VMEM-resident slab.
# --------------------------------------------------------------------------------------------
def ensemble_actor_kernel(x_ref, slab_ref, out_ref, *, obs, ehid):
    r_w1, r_b1, r_w2, r_b2, r_wh, r_bh, _ = _row_offsets(obs, ehid)

    x = x_ref[...]                                                    # (B, OBS)

    w1 = slab_ref[r_w1:r_w1 + obs, :]                                 # (OBS,  E*HID)
    b1 = slab_ref[r_b1:r_b1 + 1, :]                                   # (1,    E*HID)
    w2 = slab_ref[r_w2:r_w2 + ehid, :]                                # (E*HID,E*HID) block-diag
    b2 = slab_ref[r_b2:r_b2 + 1, :]                                   # (1,    E*HID)
    wh = slab_ref[r_wh:r_wh + ehid, :]                                # (E*HID,LANES) heads/E
    bh = slab_ref[r_bh:r_bh + 1, :]                                   # (1,    LANES) bias/E

    # Layer 1: all E members at once -> lane-dense (B, E*HID).
    h1 = jnp.maximum(jnp.dot(x, w1, preferred_element_type=jnp.float32) + b1, 0.0)
    # Layer 2: block-diagonal weight keeps members independent.
    h2 = jnp.maximum(jnp.dot(h1, w2, preferred_element_type=jnp.float32) + b2, 0.0)
    # Heads: one MXU pass = mu||log_std for all members + ensemble mean (1/E folded at pack time).
    out_ref[...] = (jnp.dot(h2, wh, preferred_element_type=jnp.float32) + bh).astype(out_ref.dtype)


# --------------------------------------------------------------------------------------------
# One-time wrapper-side weight packing into a single (R, E*HID) fp32 slab.
# --------------------------------------------------------------------------------------------
def _block_diag(blocks):
    e = len(blocks)
    r, c = blocks[0].shape
    out = jnp.zeros((e * r, e * c), blocks[0].dtype)
    for i, blk in enumerate(blocks):
        out = out.at[i * r:(i + 1) * r, i * c:(i + 1) * c].set(blk)
    return out


def pack_ensemble_params(w1, b1, w2, b2, wmu, bmu, wls, bls):
    """Pack stacked ensemble params (E, IN, OUT) into one lane-dense fused slab."""
    E, OBS, HID = w1.shape
    ACT = wmu.shape[2]
    EHID = E * HID
    assert EHID % 128 == 0, "E*HID must be a multiple of 128 lanes"
    assert 2 * ACT <= EHID, "head outputs must fit in the slab lane width"

    r_w1, r_b1, r_w2, r_b2, r_wh, r_bh, total = _row_offsets(OBS, EHID)
    slab = jnp.zeros((total, EHID), jnp.float32)

    # Layer 1: concat members along the output (lane) dim; member-major column ordering.
    w1p = jnp.transpose(w1, (1, 0, 2)).reshape(OBS, EHID)
    b1p = b1.reshape(1, EHID)
    # Layer 2: block-diagonal so member activations stay independent.
    w2bd = _block_diag([w2[e] for e in range(E)])
    b2p = b2.reshape(1, EHID)
    # Heads: fuse mu||log_std per member, stack members along the contraction dim (=> the matmul
    # also performs the ensemble sum), fold the 1/E mean into the weights and summed bias.
    whs = (jnp.concatenate([wmu, wls], axis=2).reshape(EHID, 2 * ACT) / E)
    bhs = (jnp.sum(jnp.concatenate([bmu, bls], axis=2), axis=0) / E)      # (1, 2*ACT)

    slab = slab.at[r_w1:r_w1 + OBS, :].set(w1p)
    slab = slab.at[r_b1:r_b1 + 1, :].set(b1p)
    slab = slab.at[r_w2:r_w2 + EHID, :].set(w2bd)
    slab = slab.at[r_b2:r_b2 + 1, :].set(b2p)
    slab = slab.at[r_wh:r_wh + EHID, :2 * ACT].set(whs)                   # zero-padded to EHID lanes
    slab = slab.at[r_bh:r_bh + 1, :2 * ACT].set(bhs)
    return slab


# --------------------------------------------------------------------------------------------
# Forward wrappers.
# --------------------------------------------------------------------------------------------
_TILE_B = 128


@functools.partial(jax.jit, static_argnames=("obs", "ehid", "act_dim"))
def ensemble_actor_forward_packed(x, slab, *, obs, ehid, act_dim):
    B = x.shape[0]
    nrows = slab.shape[0]
    kern = functools.partial(ensemble_actor_kernel, obs=obs, ehid=ehid)

    if B >= 2 * _TILE_B and B % _TILE_B == 0:
        # Batch grid axis: weights stay VMEM-resident (constant index_map); "parallel" lets
        # v7x's two TensorCores split the batch tiles.
        out = pl.pallas_call(
            kern,
            out_shape=jax.ShapeDtypeStruct((B, ehid), jnp.float32),
            grid_spec=pltpu.PrefetchScalarGridSpec(
                num_scalar_prefetch=0,
                grid=(B // _TILE_B,),
                in_specs=[pl.BlockSpec((_TILE_B, obs), lambda i: (i, 0)),
                          pl.BlockSpec((nrows, ehid), lambda i: (0, 0))],
                out_specs=pl.BlockSpec((_TILE_B, ehid), lambda i: (i, 0)),
            ),
            compiler_params=pltpu.CompilerParams(dimension_semantics=("parallel",)),
        )(x, slab)
    else:
        # Small-batch (RL actor) path: one grid-less call, everything resident in VMEM, exactly
        # two input DMAs (x + slab).
        vmem = pltpu.MemorySpace.VMEM
        out = pl.pallas_call(
            kern,
            out_shape=jax.ShapeDtypeStruct((B, ehid), jnp.float32),
            in_specs=[pl.BlockSpec(memory_space=vmem)] * 2,
            out_specs=pl.BlockSpec(memory_space=vmem),
        )(x, slab)

    mu = out[:, :act_dim]
    log_std = out[:, act_dim:2 * act_dim]
    return mu, log_std


def ensemble_actor_forward(x, w1, b1, w2, b2, wmu, bmu, wls, bls):
    """Convenience wrapper: pack the stacked ensemble params (one-time), then run the kernel."""
    E, OBS, HID = w1.shape
    ACT = wmu.shape[2]
    slab = pack_ensemble_params(w1, b1, w2, b2, wmu, bmu, wls, bls)
    return ensemble_actor_forward_packed(x, slab, obs=OBS, ehid=E * HID, act_dim=ACT)


# --------------------------------------------------------------------------------------------
# Synthetic init + pure-JAX reference (vmap over ensemble + mean(dim=0)).
# --------------------------------------------------------------------------------------------
def init_ensemble_params(key, E, OBS, HID, ACT):
    ks = jax.random.split(key, 8)

    def wgt(k, shape, fan_in):
        return (jax.random.normal(k, shape, jnp.float32) / jnp.sqrt(fan_in)).astype(jnp.float32)

    w1 = wgt(ks[0], (E, OBS, HID), OBS)
    b1 = 0.01 * jax.random.normal(ks[1], (E, 1, HID), jnp.float32)
    w2 = wgt(ks[2], (E, HID, HID), HID)
    b2 = 0.01 * jax.random.normal(ks[3], (E, 1, HID), jnp.float32)
    wmu = wgt(ks[4], (E, HID, ACT), HID)
    bmu = 0.01 * jax.random.normal(ks[5], (E, 1, ACT), jnp.float32)
    wls = wgt(ks[6], (E, HID, ACT), HID)
    bls = 0.01 * jax.random.normal(ks[7], (E, 1, ACT), jnp.float32)
    return w1, b1, w2, b2, wmu, bmu, wls, bls


def reference_forward(x, w1, b1, w2, b2, wmu, bmu, wls, bls):
    def one(w1e, b1e, w2e, b2e, wmue, bmue, wlse, blse):
        h1 = jnp.maximum(x @ w1e + b1e, 0.0)
        h2 = jnp.maximum(h1 @ w2e + b2e, 0.0)
        return h2 @ wmue + bmue, h2 @ wlse + blse

    mu_all, ls_all = jax.vmap(one)(w1, b1, w2, b2, wmu, bmu, wls, bls)
    return mu_all.mean(axis=0), ls_all.mean(axis=0)


if __name__ == "__main__":
    E, OBS, HID, ACT = 4, 32, 32, 8            # E*HID = 128 -> lane-dense activations
    key = jax.random.PRNGKey(0)
    kx, kp, kx2 = jax.random.split(key, 3)
    params = init_ensemble_params(kp, E, OBS, HID, ACT)
    slab = pack_ensemble_params(*params)        # one-time parameter transformation

    # Small batch: grid-less single-call path.
    x = jax.random.normal(kx, (8, OBS), jnp.float32)
    mu, log_std = ensemble_actor_forward_packed(x, slab, obs=OBS, ehid=E * HID, act_dim=ACT)
    jax.block_until_ready((mu, log_std))
    mu_ref, ls_ref = reference_forward(x, *params)
    assert jnp.allclose(mu, mu_ref, atol=1e-4, rtol=1e-4)
    assert jnp.allclose(log_std, ls_ref, atol=1e-4, rtol=1e-4)

    # Larger batch: batch-grid ("parallel") path, weights VMEM-resident across tiles.
    xb = jax.random.normal(kx2, (256, OBS), jnp.float32)
    mub, lsb = ensemble_actor_forward_packed(xb, slab, obs=OBS, ehid=E * HID, act_dim=ACT)
    jax.block_until_ready((mub, lsb))
    mub_ref, lsb_ref = reference_forward(xb, *params)
    assert jnp.allclose(mub, mub_ref, atol=1e-4, rtol=1e-4)
    assert jnp.allclose(lsb, lsb_ref, atol=1e-4, rtol=1e-4)

    print("KERNEL_OK")
</pallas_src>

<mosaic_0001>
module attributes {stable_mosaic.version = 11 : i64} {
  func.func @ensemble_actor_kernel(%arg0: memref<8x32xf32, #tpu.memory_space<vmem>>, %arg1: memref<312x128xf32, #tpu.memory_space<vmem>>, %arg2: memref<8x128xf32, #tpu.memory_space<vmem>>) attributes {dimension_semantics = [], scalar_prefetch = 0 : i64, scratch_operands = 0 : i64, tpu.core_type = #tpu.core_type<tc>} {
    %c0 = arith.constant 0 : index
    %c0_0 = arith.constant 0 : index
    %0 = vector.load %arg0[%c0, %c0_0] : memref<8x32xf32, #tpu.memory_space<vmem>>, vector<8x32xf32>
    %c0_1 = arith.constant 0 : index
    %c0_2 = arith.constant 0 : index
    %1 = vector.load %arg1[%c0_1, %c0_2] : memref<312x128xf32, #tpu.memory_space<vmem>>, vector<32x128xf32>
    %c32 = arith.constant 32 : index
    %c0_3 = arith.constant 0 : index
    %2 = vector.load %arg1[%c32, %c0_3] : memref<312x128xf32, #tpu.memory_space<vmem>>, vector<1x128xf32>
    %c40 = arith.constant 40 : index
    %c0_4 = arith.constant 0 : index
    %3 = vector.load %arg1[%c40, %c0_4] : memref<312x128xf32, #tpu.memory_space<vmem>>, vector<128x128xf32>
    %c168 = arith.constant 168 : index
    %c0_5 = arith.constant 0 : index
    %4 = vector.load %arg1[%c168, %c0_5] : memref<312x128xf32, #tpu.memory_space<vmem>>, vector<1x128xf32>
    %c176 = arith.constant 176 : index
    %c0_6 = arith.constant 0 : index
    %5 = vector.load %arg1[%c176, %c0_6] : memref<312x128xf32, #tpu.memory_space<vmem>>, vector<128x128xf32>
    %c304 = arith.constant 304 : index
    %c0_7 = arith.constant 0 : index
    %6 = vector.load %arg1[%c304, %c0_7] : memref<312x128xf32, #tpu.memory_space<vmem>>, vector<1x128xf32>
    %cst = arith.constant dense<0.000000e+00> : vector<8x128xf32>
    %7 = tpu.matmul %0, %1, %cst {dimension_numbers = #tpu.dot_dimension_numbers<[1], [0], [0], [1], [0, 0, 1, 1], [], []>} : vector<8x32xf32>, vector<32x128xf32>, vector<8x128xf32> -> vector<8x128xf32>
    %8 = vector.broadcast %2 : vector<1x128xf32> to vector<8x128xf32>
    %9 = arith.addf %7, %8 : vector<8x128xf32>
    %cst_8 = arith.constant 0.000000e+00 : f32
    %10 = vector.broadcast %cst_8 : f32 to vector<8x128xf32>
    %11 = arith.maximumf %9, %10 : vector<8x128xf32>
    %cst_9 = arith.constant dense<0.000000e+00> : vector<8x128xf32>
    %12 = tpu.matmul %11, %3, %cst_9 {dimension_numbers = #tpu.dot_dimension_numbers<[1], [0], [0], [1], [0, 0, 1, 1], [], []>} : vector<8x128xf32>, vector<128x128xf32>, vector<8x128xf32> -> vector<8x128xf32>
    %13 = vector.broadcast %4 : vector<1x128xf32> to vector<8x128xf32>
    %14 = arith.addf %12, %13 : vector<8x128xf32>
    %cst_10 = arith.constant 0.000000e+00 : f32
    %15 = vector.broadcast %cst_10 : f32 to vector<8x128xf32>
    %16 = arith.maximumf %14, %15 : vector<8x128xf32>
    %cst_11 = arith.constant dense<0.000000e+00> : vector<8x128xf32>
    %17 = tpu.matmul %16, %5, %cst_11 {dimension_numbers = #tpu.dot_dimension_numbers<[1], [0], [0], [1], [0, 0, 1, 1], [], []>} : vector<8x128xf32>, vector<128x128xf32>, vector<8x128xf32> -> vector<8x128xf32>
    %18 = vector.broadcast %6 : vector<1x128xf32> to vector<8x128xf32>
    %19 = arith.addf %17, %18 : vector<8x128xf32>
    %c0_12 = arith.constant 0 : index
    %c0_13 = arith.constant 0 : index
    %20 = vector.load %arg2[%c0_12, %c0_13] : memref<8x128xf32, #tpu.memory_space<vmem>>, vector<8x128xf32>
    tpu.vector_store %arg2[%c0_12, %c0_13], %19 {strides = array<i32>} : memref<8x128xf32, #tpu.memory_space<vmem>>, vector<8x128xf32>,
    return
  }
}

</mosaic_0001>

<bundles_post_ra>
// kernel: ensemble_actor_forward_packed.1
= control target key start
LH: loop header
LB: loop body
LE: loop exit
PB: predicated region body
PF: predicated region fallthrough
CT: control target
= control target key end

     0   :  { %7 = vsyncpa [#allocation3], 0  ;;  %s245_s0 = inlined_call_operand.hbm [shape: f32[8,32], index: 0, kind: input, shape index: {}]   ;;  %s246_s1 = inlined_call_operand.hbm [shape: f32[312,128], index: 1, kind: input, shape index: {}]   ;;  %s247_s2 = inlined_call_operand.vmem [shape: f32[8,128], index: 2, kind: output, shape index: {}]  }
   0x1   :  { %s14_s11 = sshll.u32 %s245_s0, 4  ;;  %s15_s11 = int_to_ptr.hbm [resolvable:$true] %s14_s11 }
   0x2   :  { %8 = vsyncpa [#allocation5], 0  ;;  %s217_s12 = smov [#allocation2]   ;;  %s24_s16 = sshll.u32 %s246_s1, 4  ;;  %s25_s16 = int_to_ptr.hbm [resolvable:$true] %s24_s16 }
   0x3   :  { %s16_s13 = sshll.u32 %s217_s12, 4  ;;  %s218_s17 = smov [#allocation4]   ;;  %s17_s13 = int_to_ptr.vmem [resolvable:$true] %s16_s13 }
   0x4   :  { %19 = dma.hbm_to_vmem [thread:$0]  %s15_s11, 128, %s17_s13, [#allocation3]  }
   0x5   :  { %s26_s18 = sshll.u32 %s218_s17, 4  ;;  %s219_s19 = smov 128   ;;  %s27_s18 = int_to_ptr.vmem [resolvable:$true] %s26_s18 }
   0x6   :  { %s220_s20 = smov 8  }
   0x7   :  { %32 = dma.hbm_to_vmem [thread:$0]  %s25_s16, 4992, %s27_s18, [#allocation5], %s219_s19, %s219_s19, %s220_s20  }
   0x8   :  { %213 = dma.done.wait [#allocation3], 128  }
   0x9   :  { %214 = vsyncadd [#allocation3], 4294967168 }
   0xa   :  { %215 = dma.done.wait [#allocation5], 4992  }
   0xb   :  { %216 = vsyncadd [#allocation5], 4294962304  ;;  %v45_v0 = vld [vmem:[#allocation4 + $0x18] sm:$0xff]  ;;  %v44_v1 = vld [vmem:[#allocation4 + $0x10] sm:$0xff]  ;;  %vm82_vm0 = vcmask 261120  }
   0xc   :  { %98 = vmatpush.msra.mxu0 %v45_v0  ;;  %v62_v2 = vld [vmem:[#allocation4 + $0xa0] sm:$0xff]  ;;  %v43_v3 = vld [vmem:[#allocation4 + $0x8] sm:$0xff]  ;;  %v61_v4 = vld [vmem:[#allocation4 + $0x98] sm:$0xff] }
   0xd   :  { %108 = vmatpush.msra.mxu1 %v62_v2  ;;  %v60_v5 = vld [vmem:[#allocation4 + $0x90] sm:$0xff]  ;;  %v42_v6 = vld [vmem:[#allocation4] sm:$0xff]  ;;  %v41_v7 = vld [vmem:[#allocation2] sm:$0xff] }
   0xe   :  { %99 = vmatpush.msra.mxu0 %v44_v1  ;;  %v59_v8 = vld [vmem:[#allocation4 + $0x88] sm:$0xff]  ;;  %v58_v9 = vld [vmem:[#allocation4 + $0x80] sm:$0xff]  ;;  %v57_v10 = vld [vmem:[#allocation4 + $0x78] sm:$0xff] }
   0xf   :  { %109 = vmatpush.msra.mxu1 %v61_v4  ;;  %v56_v11 = vld [vmem:[#allocation4 + $0x70] sm:$0xff]  ;;  %v55_v12 = vld [vmem:[#allocation4 + $0x68] sm:$0xff]  ;;  %v54_v13 = vld [vmem:[#allocation4 + $0x60] sm:$0xff] }
  0x10   :  { %100 = vmatpush.msra.mxu0 %v43_v3  ;;  %v53_v14 = vld [vmem:[#allocation4 + $0x58] sm:$0xff]  ;;  %v52_v15 = vld [vmem:[#allocation4 + $0x50] sm:$0xff]  ;;  %v51_v16 = vld [vmem:[#allocation4 + $0x48] sm:$0xff] }
  0x11   :  { %110 = vmatpush.msra.mxu1 %v60_v5  ;;  %v50_v17 = vld [vmem:[#allocation4 + $0x40] sm:$0xff]  ;;  %v49_v18 = vld [vmem:[#allocation4 + $0x38] sm:$0xff]  ;;  %v48_v19 = vld [vmem:[#allocation4 + $0x30] sm:$0xff] }
  0x12   :  { %101 = vmatpush.msra.mxu0 %v42_v6  ;;  %v47_v20 = vld [vmem:[#allocation4 + $0x28] sm:$0xff]  ;;  %v78_v22 = vld [vmem:[#allocation4 + $0x120] sm:$0xff]  ;;  %v77_v23 = vld [vmem:[#allocation4 + $0x118] sm:$0xff] }
  0x13   :  { %157 = vmatmul.msk.f32.vlgmr.msra.gmra.mxu0 %vm82_vm0, %v41_v7  ;;  %111 = vmatpush.msra.mxu1 %v59_v8  ;;  %v79_v21 = vld [vmem:[#allocation4 + $0x128] sm:$0xff]  ;;  %v76_v24 = vld [vmem:[#allocation4 + $0x110] sm:$0xff]  ;;  %v74_v26 = vld [vmem:[#allocation4 + $0x100] sm:$0xff] }
  0x14   :  { %130 = vmatpush.msra.mxu2 %v79_v21  ;;  %v75_v25 = vld [vmem:[#allocation4 + $0x108] sm:$0xff]  ;;  %v73_v27 = vld [vmem:[#allocation4 + $0xf8] sm:$0xff]  ;;  %v72_v28 = vld [vmem:[#allocation4 + $0xf0] sm:$0xff] }
  0x15   :  { %112 = vmatpush.msra.mxu1 %v58_v9  ;;  %v71_v29 = vld [vmem:[#allocation4 + $0xe8] sm:$0xff]  ;;  %v70_v30 = vld [vmem:[#allocation4 + $0xe0] sm:$0xff]  ;;  %v69_v31 = vld [vmem:[#allocation4 + $0xd8] sm:$0xff] }
  0x16   :  { %131 = vmatpush.msra.mxu2 %v78_v22  ;;  %v68_v32 = vld [vmem:[#allocation4 + $0xd0] sm:$0xff]  ;;  %v67_v33 = vld [vmem:[#allocation4 + $0xc8] sm:$0xff]  ;;  %v162_v34 = vld [vmem:[#allocation4 + $0x20] ss:$0 sm:$0xff] }
  0x17   :  { %113 = vmatpush.msra.mxu1 %v57_v10  ;;  %v66_v38 = vld [vmem:[#allocation4 + $0xc0] sm:$0xff]  ;;  %v65_v39 = vld [vmem:[#allocation4 + $0xb8] sm:$0xff]  ;;  %v64_v40 = vld [vmem:[#allocation4 + $0xb0] sm:$0xff] }
  0x18   :  { %132 = vmatpush.msra.mxu2 %v77_v23  ;;  %v163_v41 = vld [vmem:[#allocation4 + $0xa8] ss:$0 sm:$0xff]  ;;  %v164_v45 = vld [vmem:[#allocation4 + $0x130] ss:$0 sm:$0xff] }
  0x19   :  { %114 = vmatpush.msra.mxu1 %v56_v11 }
  0x1a   :  { %133 = vmatpush.msra.mxu2 %v76_v24 }
  0x1b   :  { %115 = vmatpush.msra.mxu1 %v55_v12 }
  0x1c   :  { %134 = vmatpush.msra.mxu2 %v75_v25 }
  0x1d   :  { %116 = vmatpush.msra.mxu1 %v54_v13 }
  0x1e   :  { %135 = vmatpush.msra.mxu2 %v74_v26 }
  0x1f   :  { %117 = vmatpush.msra.mxu1 %v53_v14 }
  0x20   :  { %136 = vmatpush.msra.mxu2 %v73_v27 }
  0x21   :  { %118 = vmatpush.msra.mxu1 %v52_v15 }
  0x22   :  { %137 = vmatpush.msra.mxu2 %v72_v28 }
  0x23   :  { %119 = vmatpush.msra.mxu1 %v51_v16 }
  0x24   :  { %138 = vmatpush.msra.mxu2 %v71_v29 }
  0x25   :  { %120 = vmatpush.msra.mxu1 %v50_v17 }
  0x26   :  { %139 = vmatpush.msra.mxu2 %v70_v30 }
  0x27   :  { %121 = vmatpush.msra.mxu1 %v49_v18 }
  0x28   :  { %140 = vmatpush.msra.mxu2 %v69_v31 }
  0x29   :  { %122 = vmatpush.msra.mxu1 %v48_v19 }
  0x2a   :  { %141 = vmatpush.msra.mxu2 %v68_v32 }
  0x2b   :  { %123 = vmatpush.msra.mxu1 %v47_v20 }
  0x2c   :  { %142 = vmatpush.msra.mxu2 %v67_v33 }
  0x2e   :  { %143 = vmatpush.msra.mxu2 %v66_v38 }
  0x30   :  { %144 = vmatpush.msra.mxu2 %v65_v39 }
  0x32   :  { %145 = vmatpush.msra.mxu2 %v64_v40 }
  0x90   :  { %v103_v35 = vpop.f32.mrf.mxu0 }
  0x91   :  { %v104_v36 = vadd.f32 %v162_v34, %v103_v35 }
  0x93   :  { %v106_v37 = vmax.f32 %v104_v36, 0.0 }
  0x95   :  { %124 = vmatmul.f32.vlgmr.msra.gmra.mxu1 %v106_v37 }
 0x112   :  { %v125_v42 = vpop.f32.mrf.mxu1 }
 0x113   :  { %v126_v43 = vadd.f32 %v163_v41, %v125_v42 }
 0x115   :  { %v128_v44 = vmax.f32 %v126_v43, 0.0 }
 0x117   :  { %146 = vmatmul.f32.vlgmr.msra.gmra.mxu2 %v128_v44 }
 0x19a   :  { %v147_v46 = vpop.f32.mrf.mxu2 }
 0x19b   :  { %v148_v47 = vadd.f32 %v164_v45, %v147_v46 }
 0x19d   :  { %150 = vst [vmem:[%s247_s2] sm:$0xff] %v148_v47 }
 0x19e   :  { %155 = vsyncpa [#allocation3], 1 }
 0x19f   :  { %156 = vsyncpa [#allocation5], 1 }

</bundles_post_ra>
